<compile_context>
chip_gen: v6e
topology: v6e:2x2x1
jax: 0.10.0
libtpu: 0.0.40
codegen_flags: <defaults>
</compile_context>

<pallas_src>
import functools

import jax
import jax.numpy as jnp
from jax.experimental import pallas as pl
from jax.experimental.pallas import tpu as pltpu

LANE = 128      # lane width: pad every feature dim to this (lane-dense everywhere)
SUBLANE = 8     # sublane granularity: batch rows / bias replication


def _layer_tuples(input_dim):
    """Reproduce Net.instantiate_network's (prev, cur) halving schedule."""
    prev, cur, tuples = input_dim, input_dim, []
    while cur != 1:
        cur = prev // 2
        tuples.append((prev, cur))
        prev = cur
    return tuples


def init_params(key, input_dim):
    """Deterministic parameter init mimicking nn.Linear (U(-1/sqrt(in), 1/sqrt(in)))."""
    tuples = _layer_tuples(input_dim)
    enc, dec = [], []
    for (in_d, out_d) in tuples:
        key, kw, kb = jax.random.split(key, 3)
        bound = 1.0 / jnp.sqrt(in_d)
        enc.append((jax.random.uniform(kw, (out_d, in_d), jnp.float32, -bound, bound),
                    jax.random.uniform(kb, (out_d,), jnp.float32, -bound, bound)))
    for (in_d, out_d) in tuples[::-1]:
        # decoder layer: Linear(out_d -> in_d)  (reversed schedule, as in the torch code)
        key, kw, kb = jax.random.split(key, 3)
        bound = 1.0 / jnp.sqrt(out_d)
        dec.append((jax.random.uniform(kw, (in_d, out_d), jnp.float32, -bound, bound),
                    jax.random.uniform(kb, (in_d,), jnp.float32, -bound, bound)))
    return enc, dec


def pack_net(enc_layers, dec_layers):
    """Pack the whole network ONCE (init-time, not per-call) into two flat VMEM buffers.

    w_packed: (L*dpad, dpad) f32, layer l's weight pre-transposed to (in, out) at rows
              [l*dpad, (l+1)*dpad); everything else zero.
    b_packed: (L*8, dpad) f32, layer l's bias replicated over 8 sublanes at rows
              [l*8, (l+1)*8); everything else zero.
    """
    layers = list(enc_layers) + list(dec_layers)
    L = len(layers)
    dmax = max(max(w.shape) for w, _ in layers)
    dpad = max(LANE, ((dmax + LANE - 1) // LANE) * LANE)

    w_packed = jnp.zeros((L * dpad, dpad), jnp.float32)
    b_packed = jnp.zeros((L * SUBLANE, dpad), jnp.float32)
    for l, (w, b) in enumerate(layers):
        out_d, in_d = w.shape
        w_packed = w_packed.at[l * dpad:l * dpad + in_d, :out_d].set(w.T)
        b_packed = b_packed.at[l * SUBLANE:(l + 1) * SUBLANE, :out_d].set(
            jnp.broadcast_to(b[None, :], (SUBLANE, out_d)))

    meta = dict(
        num_layers=L,
        num_enc=len(enc_layers),
        dpad=dpad,
        in_dim=enc_layers[0][0].shape[1],
        latent_dim=enc_layers[-1][0].shape[0],
        out_dim=dec_layers[-1][0].shape[0],
    )
    return w_packed, b_packed, meta


def _fused_ae_kernel(x_ref, w_ref, b_ref, z_ref, out_ref, *,
                     num_layers, num_enc, dpad, block_b):
    """Full Linear+ReLU chain; activation stays resident in vregs across all layers."""
    y = x_ref[...]                                          # (block_b, dpad) f32
    for l in range(num_layers):                             # static unroll (2*log2(input_dim))
        w = w_ref[l * dpad:(l + 1) * dpad, :]               # (dpad, dpad) static slice view
        b = b_ref[l * SUBLANE:(l + 1) * SUBLANE, :]         # (8, dpad), pre-replicated bias
        y = jnp.dot(y, w, preferred_element_type=jnp.float32)
        y = y + (b if block_b == SUBLANE else b[0:1, :])    # no sublane broadcast when B==8
        y = jnp.maximum(y, 0.0)                             # F.relu
        if l == num_enc - 1:
            z_ref[...] = y                                  # lane-dense latent store
    out_ref[...] = y                                        # lane-dense reconstruction store


def vae_forward_pallas(x, w_packed, b_packed, meta, *, max_block_b=512):
    """Fused Net.forward(x, enc) + Net.forward(z, dec). Returns (z, x_rec) in true shapes."""
    B, in_dim = x.shape
    dpad = meta["dpad"]
    L = meta["num_layers"]

    # Batch tiling: one lane-dense block at demo size; parallel grid when batch grows.
    Bp = max(SUBLANE, ((B + SUBLANE - 1) // SUBLANE) * SUBLANE)
    block_b = min(Bp, max_block_b)
    Bp = ((Bp + block_b - 1) // block_b) * block_b
    grid = (Bp // block_b,)

    x_p = jnp.zeros((Bp, dpad), jnp.float32).at[:B, :in_dim].set(x)

    kernel = functools.partial(_fused_ae_kernel, num_layers=L, num_enc=meta["num_enc"],
                               dpad=dpad, block_b=block_b)

    z_pad, rec_pad = pl.pallas_call(
        kernel,
        out_shape=(jax.ShapeDtypeStruct((Bp, dpad), jnp.float32),
                   jax.ShapeDtypeStruct((Bp, dpad), jnp.float32)),
        grid=grid,
        in_specs=[
            pl.BlockSpec((block_b, dpad), lambda i: (i, 0)),          # x: sharded over batch
            pl.BlockSpec((L * dpad, dpad), lambda i: (0, 0)),         # weights: VMEM-resident
            pl.BlockSpec((L * SUBLANE, dpad), lambda i: (0, 0)),      # biases: VMEM-resident
        ],
        out_specs=(
            pl.BlockSpec((block_b, dpad), lambda i: (i, 0)),          # latent (lane-dense)
            pl.BlockSpec((block_b, dpad), lambda i: (i, 0)),          # reconstruction
        ),
        compiler_params=pltpu.CompilerParams(
            dimension_semantics=("parallel",)),
    )(x_p, w_packed, b_packed)

    z = z_pad[:B, :meta["latent_dim"]]
    x_rec = rec_pad[:B, :meta["out_dim"]]
    return z, x_rec


def forward_reference(x, layers):
    """Pure-JAX reference of Net.forward(x, direction)."""
    y = x
    for w, b in layers:
        y = jnp.maximum(y @ w.T + b, 0.0)
    return y


if __name__ == "__main__":
    input_dim = 32
    batch = 8

    key = jax.random.PRNGKey(0)
    key, kx = jax.random.split(key)
    x = jax.random.normal(kx, (batch, input_dim), jnp.float32)

    enc_layers, dec_layers = init_params(key, input_dim)

    # Pack weights ONCE (hoisted out of the per-call path).
    w_packed, b_packed, meta = pack_net(enc_layers, dec_layers)
    jax.block_until_ready((w_packed, b_packed))

    fwd = jax.jit(lambda xx: vae_forward_pallas(xx, w_packed, b_packed, meta))

    # Fused encoder+decoder pass: z = forward(x, enc); x_rec = forward(z, dec)
    z, x_rec = fwd(x)
    jax.block_until_ready((z, x_rec))

    # Correctness check against a pure-JAX reference of the torch forward.
    z_ref = forward_reference(x, enc_layers)
    x_rec_ref = forward_reference(z_ref, dec_layers)
    assert z.shape == z_ref.shape and x_rec.shape == x_rec_ref.shape
    assert jnp.allclose(z, z_ref, atol=1e-5, rtol=1e-5)
    assert jnp.allclose(x_rec, x_rec_ref, atol=1e-5, rtol=1e-5)

    print("KERNEL_OK")
</pallas_src>

<mosaic_0001>
module attributes {stable_mosaic.version = 11 : i64} {
  func.func @_fused_ae_kernel(%arg0: i32, %arg1: memref<8x128xf32, #tpu.memory_space<vmem>>, %arg2: memref<1280x128xf32, #tpu.memory_space<vmem>>, %arg3: memref<80x128xf32, #tpu.memory_space<vmem>>, %arg4: memref<8x128xf32, #tpu.memory_space<vmem>>, %arg5: memref<8x128xf32, #tpu.memory_space<vmem>>) attributes {dimension_semantics = [#tpu.dimension_semantics<parallel>], iteration_bounds = array<i64: 1>, scalar_prefetch = 0 : i64, scratch_operands = 0 : i64, tpu.core_type = #tpu.core_type<tc>, window_params = [{transform_indices = @transform_0, window_bounds = array<i64: 8, 128>}, {pipeline_mode = #tpu.pipeline_mode<synchronous>, transform_indices = @transform_1, window_bounds = array<i64: 1280, 128>}, {pipeline_mode = #tpu.pipeline_mode<synchronous>, transform_indices = @transform_2, window_bounds = array<i64: 80, 128>}, {transform_indices = @transform_3, window_bounds = array<i64: 8, 128>}, {transform_indices = @transform_4, window_bounds = array<i64: 8, 128>}]} {
    %c0 = arith.constant 0 : index
    %c0_0 = arith.constant 0 : index
    %0 = vector.load %arg1[%c0, %c0_0] : memref<8x128xf32, #tpu.memory_space<vmem>>, vector<8x128xf32>
    %c0_1 = arith.constant 0 : index
    %c0_2 = arith.constant 0 : index
    %1 = vector.load %arg2[%c0_1, %c0_2] : memref<1280x128xf32, #tpu.memory_space<vmem>>, vector<128x128xf32>
    %c0_3 = arith.constant 0 : index
    %c0_4 = arith.constant 0 : index
    %2 = vector.load %arg3[%c0_3, %c0_4] : memref<80x128xf32, #tpu.memory_space<vmem>>, vector<8x128xf32>
    %cst = arith.constant dense<0.000000e+00> : vector<8x128xf32>
    %3 = tpu.matmul %0, %1, %cst {dimension_numbers = #tpu.dot_dimension_numbers<[1], [0], [0], [1], [0, 0, 1, 1], [], []>} : vector<8x128xf32>, vector<128x128xf32>, vector<8x128xf32> -> vector<8x128xf32>
    %4 = arith.addf %3, %2 : vector<8x128xf32>
    %cst_5 = arith.constant 0.000000e+00 : f32
    %5 = vector.broadcast %cst_5 : f32 to vector<8x128xf32>
    %6 = arith.maximumf %4, %5 : vector<8x128xf32>
    %c128 = arith.constant 128 : index
    %c0_6 = arith.constant 0 : index
    %7 = vector.load %arg2[%c128, %c0_6] : memref<1280x128xf32, #tpu.memory_space<vmem>>, vector<128x128xf32>
    %c8 = arith.constant 8 : index
    %c0_7 = arith.constant 0 : index
    %8 = vector.load %arg3[%c8, %c0_7] : memref<80x128xf32, #tpu.memory_space<vmem>>, vector<8x128xf32>
    %cst_8 = arith.constant dense<0.000000e+00> : vector<8x128xf32>
    %9 = tpu.matmul %6, %7, %cst_8 {dimension_numbers = #tpu.dot_dimension_numbers<[1], [0], [0], [1], [0, 0, 1, 1], [], []>} : vector<8x128xf32>, vector<128x128xf32>, vector<8x128xf32> -> vector<8x128xf32>
    %10 = arith.addf %9, %8 : vector<8x128xf32>
    %cst_9 = arith.constant 0.000000e+00 : f32
    %11 = vector.broadcast %cst_9 : f32 to vector<8x128xf32>
    %12 = arith.maximumf %10, %11 : vector<8x128xf32>
    %c256 = arith.constant 256 : index
    %c0_10 = arith.constant 0 : index
    %13 = vector.load %arg2[%c256, %c0_10] : memref<1280x128xf32, #tpu.memory_space<vmem>>, vector<128x128xf32>
    %c16 = arith.constant 16 : index
    %c0_11 = arith.constant 0 : index
    %14 = vector.load %arg3[%c16, %c0_11] : memref<80x128xf32, #tpu.memory_space<vmem>>, vector<8x128xf32>
    %cst_12 = arith.constant dense<0.000000e+00> : vector<8x128xf32>
    %15 = tpu.matmul %12, %13, %cst_12 {dimension_numbers = #tpu.dot_dimension_numbers<[1], [0], [0], [1], [0, 0, 1, 1], [], []>} : vector<8x128xf32>, vector<128x128xf32>, vector<8x128xf32> -> vector<8x128xf32>
    %16 = arith.addf %15, %14 : vector<8x128xf32>
    %cst_13 = arith.constant 0.000000e+00 : f32
    %17 = vector.broadcast %cst_13 : f32 to vector<8x128xf32>
    %18 = arith.maximumf %16, %17 : vector<8x128xf32>
    %c384 = arith.constant 384 : index
    %c0_14 = arith.constant 0 : index
    %19 = vector.load %arg2[%c384, %c0_14] : memref<1280x128xf32, #tpu.memory_space<vmem>>, vector<128x128xf32>
    %c24 = arith.constant 24 : index
    %c0_15 = arith.constant 0 : index
    %20 = vector.load %arg3[%c24, %c0_15] : memref<80x128xf32, #tpu.memory_space<vmem>>, vector<8x128xf32>
    %cst_16 = arith.constant dense<0.000000e+00> : vector<8x128xf32>
    %21 = tpu.matmul %18, %19, %cst_16 {dimension_numbers = #tpu.dot_dimension_numbers<[1], [0], [0], [1], [0, 0, 1, 1], [], []>} : vector<8x128xf32>, vector<128x128xf32>, vector<8x128xf32> -> vector<8x128xf32>
    %22 = arith.addf %21, %20 : vector<8x128xf32>
    %cst_17 = arith.constant 0.000000e+00 : f32
    %23 = vector.broadcast %cst_17 : f32 to vector<8x128xf32>
    %24 = arith.maximumf %22, %23 : vector<8x128xf32>
    %c512 = arith.constant 512 : index
    %c0_18 = arith.constant 0 : index
    %25 = vector.load %arg2[%c512, %c0_18] : memref<1280x128xf32, #tpu.memory_space<vmem>>, vector<128x128xf32>
    %c32 = arith.constant 32 : index
    %c0_19 = arith.constant 0 : index
    %26 = vector.load %arg3[%c32, %c0_19] : memref<80x128xf32, #tpu.memory_space<vmem>>, vector<8x128xf32>
    %cst_20 = arith.constant dense<0.000000e+00> : vector<8x128xf32>
    %27 = tpu.matmul %24, %25, %cst_20 {dimension_numbers = #tpu.dot_dimension_numbers<[1], [0], [0], [1], [0, 0, 1, 1], [], []>} : vector<8x128xf32>, vector<128x128xf32>, vector<8x128xf32> -> vector<8x128xf32>
    %28 = arith.addf %27, %26 : vector<8x128xf32>
    %cst_21 = arith.constant 0.000000e+00 : f32
    %29 = vector.broadcast %cst_21 : f32 to vector<8x128xf32>
    %30 = arith.maximumf %28, %29 : vector<8x128xf32>
    %c0_22 = arith.constant 0 : index
    %c0_23 = arith.constant 0 : index
    %31 = vector.load %arg4[%c0_22, %c0_23] : memref<8x128xf32, #tpu.memory_space<vmem>>, vector<8x128xf32>
    tpu.vector_store %arg4[%c0_22, %c0_23], %30 {strides = array<i32>} : memref<8x128xf32, #tpu.memory_space<vmem>>, vector<8x128xf32>,
    %c640 = arith.constant 640 : index
    %c0_24 = arith.constant 0 : index
    %32 = vector.load %arg2[%c640, %c0_24] : memref<1280x128xf32, #tpu.memory_space<vmem>>, vector<128x128xf32>
    %c40 = arith.constant 40 : index
    %c0_25 = arith.constant 0 : index
    %33 = vector.load %arg3[%c40, %c0_25] : memref<80x128xf32, #tpu.memory_space<vmem>>, vector<8x128xf32>
    %cst_26 = arith.constant dense<0.000000e+00> : vector<8x128xf32>
    %34 = tpu.matmul %30, %32, %cst_26 {dimension_numbers = #tpu.dot_dimension_numbers<[1], [0], [0], [1], [0, 0, 1, 1], [], []>} : vector<8x128xf32>, vector<128x128xf32>, vector<8x128xf32> -> vector<8x128xf32>
    %35 = arith.addf %34, %33 : vector<8x128xf32>
    %cst_27 = arith.constant 0.000000e+00 : f32
    %36 = vector.broadcast %cst_27 : f32 to vector<8x128xf32>
    %37 = arith.maximumf %35, %36 : vector<8x128xf32>
    %c768 = arith.constant 768 : index
    %c0_28 = arith.constant 0 : index
    %38 = vector.load %arg2[%c768, %c0_28] : memref<1280x128xf32, #tpu.memory_space<vmem>>, vector<128x128xf32>
    %c48 = arith.constant 48 : index
    %c0_29 = arith.constant 0 : index
    %39 = vector.load %arg3[%c48, %c0_29] : memref<80x128xf32, #tpu.memory_space<vmem>>, vector<8x128xf32>
    %cst_30 = arith.constant dense<0.000000e+00> : vector<8x128xf32>
    %40 = tpu.matmul %37, %38, %cst_30 {dimension_numbers = #tpu.dot_dimension_numbers<[1], [0], [0], [1], [0, 0, 1, 1], [], []>} : vector<8x128xf32>, vector<128x128xf32>, vector<8x128xf32> -> vector<8x128xf32>
    %41 = arith.addf %40, %39 : vector<8x128xf32>
    %cst_31 = arith.constant 0.000000e+00 : f32
    %42 = vector.broadcast %cst_31 : f32 to vector<8x128xf32>
    %43 = arith.maximumf %41, %42 : vector<8x128xf32>
    %c896 = arith.constant 896 : index
    %c0_32 = arith.constant 0 : index
    %44 = vector.load %arg2[%c896, %c0_32] : memref<1280x128xf32, #tpu.memory_space<vmem>>, vector<128x128xf32>
    %c56 = arith.constant 56 : index
    %c0_33 = arith.constant 0 : index
    %45 = vector.load %arg3[%c56, %c0_33] : memref<80x128xf32, #tpu.memory_space<vmem>>, vector<8x128xf32>
    %cst_34 = arith.constant dense<0.000000e+00> : vector<8x128xf32>
    %46 = tpu.matmul %43, %44, %cst_34 {dimension_numbers = #tpu.dot_dimension_numbers<[1], [0], [0], [1], [0, 0, 1, 1], [], []>} : vector<8x128xf32>, vector<128x128xf32>, vector<8x128xf32> -> vector<8x128xf32>
    %47 = arith.addf %46, %45 : vector<8x128xf32>
    %cst_35 = arith.constant 0.000000e+00 : f32
    %48 = vector.broadcast %cst_35 : f32 to vector<8x128xf32>
    %49 = arith.maximumf %47, %48 : vector<8x128xf32>
    %c1024 = arith.constant 1024 : index
    %c0_36 = arith.constant 0 : index
    %50 = vector.load %arg2[%c1024, %c0_36] : memref<1280x128xf32, #tpu.memory_space<vmem>>, vector<128x128xf32>
    %c64 = arith.constant 64 : index
    %c0_37 = arith.constant 0 : index
    %51 = vector.load %arg3[%c64, %c0_37] : memref<80x128xf32, #tpu.memory_space<vmem>>, vector<8x128xf32>
    %cst_38 = arith.constant dense<0.000000e+00> : vector<8x128xf32>
    %52 = tpu.matmul %49, %50, %cst_38 {dimension_numbers = #tpu.dot_dimension_numbers<[1], [0], [0], [1], [0, 0, 1, 1], [], []>} : vector<8x128xf32>, vector<128x128xf32>, vector<8x128xf32> -> vector<8x128xf32>
    %53 = arith.addf %52, %51 : vector<8x128xf32>
    %cst_39 = arith.constant 0.000000e+00 : f32
    %54 = vector.broadcast %cst_39 : f32 to vector<8x128xf32>
    %55 = arith.maximumf %53, %54 : vector<8x128xf32>
    %c1152 = arith.constant 1152 : index
    %c0_40 = arith.constant 0 : index
    %56 = vector.load %arg2[%c1152, %c0_40] : memref<1280x128xf32, #tpu.memory_space<vmem>>, vector<128x128xf32>
    %c72 = arith.constant 72 : index
    %c0_41 = arith.constant 0 : index
    %57 = vector.load %arg3[%c72, %c0_41] : memref<80x128xf32, #tpu.memory_space<vmem>>, vector<8x128xf32>
    %cst_42 = arith.constant dense<0.000000e+00> : vector<8x128xf32>
    %58 = tpu.matmul %55, %56, %cst_42 {dimension_numbers = #tpu.dot_dimension_numbers<[1], [0], [0], [1], [0, 0, 1, 1], [], []>} : vector<8x128xf32>, vector<128x128xf32>, vector<8x128xf32> -> vector<8x128xf32>
    %59 = arith.addf %58, %57 : vector<8x128xf32>
    %cst_43 = arith.constant 0.000000e+00 : f32
    %60 = vector.broadcast %cst_43 : f32 to vector<8x128xf32>
    %61 = arith.maximumf %59, %60 : vector<8x128xf32>
    %c0_44 = arith.constant 0 : index
    %c0_45 = arith.constant 0 : index
    %62 = vector.load %arg5[%c0_44, %c0_45] : memref<8x128xf32, #tpu.memory_space<vmem>>, vector<8x128xf32>
    tpu.vector_store %arg5[%c0_44, %c0_45], %61 {strides = array<i32>} : memref<8x128xf32, #tpu.memory_space<vmem>>, vector<8x128xf32>,
    return
  }
  func.func @transform_0(%arg0: i32) -> (i32, i32) {
    %c0_i32 = arith.constant 0 : i32
    %c0_i32_0 = arith.constant 0 : i32
    return %arg0, %c0_i32 : i32, i32
  }
  func.func @transform_1(%arg0: i32) -> (i32, i32) {
    %c0_i32 = arith.constant 0 : i32
    %c0_i32_0 = arith.constant 0 : i32
    %c0_i32_1 = arith.constant 0 : i32
    return %c0_i32, %c0_i32_0 : i32, i32
  }
  func.func @transform_2(%arg0: i32) -> (i32, i32) {
    %c0_i32 = arith.constant 0 : i32
    %c0_i32_0 = arith.constant 0 : i32
    %c0_i32_1 = arith.constant 0 : i32
    return %c0_i32, %c0_i32_0 : i32, i32
  }
  func.func @transform_3(%arg0: i32) -> (i32, i32) {
    %c0_i32 = arith.constant 0 : i32
    %c0_i32_0 = arith.constant 0 : i32
    return %arg0, %c0_i32 : i32, i32
  }
  func.func @transform_4(%arg0: i32) -> (i32, i32) {
    %c0_i32 = arith.constant 0 : i32
    %c0_i32_0 = arith.constant 0 : i32
    return %arg0, %c0_i32 : i32, i32
  }
}

</mosaic_0001>

<bundles_post_ra>
// kernel: _lambda_.1
= control target key start
LH: loop header
LB: loop body
LE: loop exit
PB: predicated region body
PF: predicated region fallthrough
CT: control target
= control target key end

     0   :  { %10 = vsyncpa [#allocation3], 0  ;;  %s1768_s0 = inlined_call_operand.vmem [shape: f32[8,128], index: 0, kind: input, shape index: {}]   ;;  %s1769_s1 = inlined_call_operand.hbm [shape: f32[1280,128], index: 1, kind: input, shape index: {}]   ;;  %s1770_s2 = inlined_call_operand.hbm [shape: f32[80,128], index: 2, kind: input, shape index: {}]   ;;  %s1771_s3 = inlined_call_operand.vmem [shape: f32[8,128], index: 3, kind: output, shape index: {0}]   ;;  %s1772_s4 = inlined_call_operand.hbm [shape: f32[8,128], index: 4, kind: output, shape index: {1}]  }
   0x1   :  { %11 = vsyncpa [#allocation6], 0 }
   0x2   :  { %12 = vsyncpa [#allocation4], 0  ;;  %s1541_s15 = smov [#allocation2]  }
   0x3   :  { %s20_s16 = sshll.u32 %s1541_s15, 4  ;;  %s21_s16 = int_to_ptr.vmem [resolvable:$true] %s20_s16 }
   0x4   :  { %s1483_s17 = scalar_lea.vmem %s21_s16, 20480  ;;  %p1488_p1 = scmp.lt.s32.totalorder %s21_s16, %s21_s16 }
   0x5   :  { %p1484_p0 = scmp.ne.s32.totalorder %s21_s16, %s1483_s17  ;;  %p1489_p2 = scmp.lt.s32.totalorder %s1483_s17, %s1483_s17 }
   0x7   :  { %p1490_p3 = por %p1489_p2, %p1488_p1 }
   0x9   :  { %p1491_p4 = pnand %p1490_p3, %p1484_p0 }
   0xb   :  { %1494 = shalt.err (!%p1491_p4)
}
   0xc   :  { %s1542_s18 = smov 128   ;;  %s1543_s19 = smov 8  }
   0xd   :  { %26 = dma.hbm_to_vmem [thread:$0]  %s1769_s1, 20480, %s21_s16, [#allocation3], %s1542_s18, %s1542_s18, %s1543_s19  }
   0xe   :  { %s1544_s22 = smov [#allocation5]  }
   0xf   :  { %s32_s23 = sshll.u32 %s1544_s22, 4  ;;  %s33_s23 = int_to_ptr.vmem [resolvable:$true] %s32_s23 }
  0x10   :  { %s1503_s24 = scalar_lea.vmem %s33_s23, 1280  ;;  %p1508_p6 = scmp.lt.s32.totalorder %s33_s23, %s33_s23 }
  0x11   :  { %p1504_p5 = scmp.ne.s32.totalorder %s33_s23, %s1503_s24  ;;  %p1509_p7 = scmp.lt.s32.totalorder %s1503_s24, %s1503_s24 }
  0x13   :  { %p1510_p8 = por %p1509_p7, %p1508_p6 }
  0x15   :  { %p1511_p9 = pnand %p1510_p8, %p1504_p5 }
  0x17   :  { %1514 = shalt.err (!%p1511_p9)
}
  0x18   :  { %38 = dma.hbm_to_vmem [thread:$0]  %s1770_s2, 1280, %s33_s23, [#allocation6], %s1542_s18, %s1542_s18, %s1543_s19  }
  0x19   :  { %1535 = dma.done.wait [#allocation3], 20480  }
  0x1a   :  { %1536 = vsyncadd [#allocation3], 4294946816 }
  0x1b   :  { %1537 = dma.done.wait [#allocation6], 1280  }
  0x1c   :  { %1538 = vsyncadd [#allocation6], 4294966016  ;;  %v1545_v0 = vmov 0.0   ;;  %vm1546_vm0 = vmmov 0   ;;  %v61_v1 = vld [vmem:[#allocation2 + $0x78] sm:$0xff]  ;;  %v60_v2 = vld [vmem:[#allocation2 + $0x70] sm:$0xff] }
  0x1d   :  { %1118 = vmatprep.subr.mxu0 %v1545_v0  ;;  %1150 = vmatprep.mubr.msk.f32.mxu0 %vm1546_vm0, %v1545_v0  ;;  %v59_v3 = vld [vmem:[#allocation2 + $0x68] sm:$0xff]  ;;  %v58_v4 = vld [vmem:[#allocation2 + $0x60] sm:$0xff]  ;;  %v149_v5 = vld [vmem:[#allocation2 + $0xf8] sm:$0xff] }
  0x1e   :  { %1153 = vmatprep.subr.mxu1 %v1545_v0  ;;  %1185 = vmatprep.mubr.msk.f32.mxu1 %vm1546_vm0, %v1545_v0  ;;  %v57_v6 = vld [vmem:[#allocation2 + $0x58] sm:$0xff]  ;;  %v148_v7 = vld [vmem:[#allocation2 + $0xf0] sm:$0xff]  ;;  %v147_v8 = vld [vmem:[#allocation2 + $0xe8] sm:$0xff] }
  0x1f   :  { %1119 = vmatpush3.msra.mxu0 %v61_v1  ;;  %1154 = vmatpush3.msra.mxu1 %v149_v5  ;;  %v56_v9 = vld [vmem:[#allocation2 + $0x50] sm:$0xff]  ;;  %v146_v10 = vld [vmem:[#allocation2 + $0xe0] sm:$0xff]  ;;  %v55_v11 = vld [vmem:[#allocation2 + $0x48] sm:$0xff] }
  0x20   :  { %1120 = vmatprep.subr.mxu0 %v1545_v0  ;;  %1155 = vmatprep.subr.mxu1 %v1545_v0  ;;  %v145_v12 = vld [vmem:[#allocation2 + $0xd8] sm:$0xff]  ;;  %v54_v13 = vld [vmem:[#allocation2 + $0x40] sm:$0xff]  ;;  %v144_v14 = vld [vmem:[#allocation2 + $0xd0] sm:$0xff] }
  0x21   :  { %1121 = vmatpush3.msra.mxu0 %v60_v2  ;;  %1156 = vmatpush3.msra.mxu1 %v148_v7  ;;  %v53_v15 = vld [vmem:[#allocation2 + $0x38] sm:$0xff]  ;;  %v143_v16 = vld [vmem:[#allocation2 + $0xc8] sm:$0xff]  ;;  %v52_v17 = vld [vmem:[#allocation2 + $0x30] sm:$0xff] }
  0x22   :  { %1122 = vmatprep.subr.mxu0 %v1545_v0  ;;  %1157 = vmatprep.subr.mxu1 %v1545_v0  ;;  %v142_v18 = vld [vmem:[#allocation2 + $0xc0] sm:$0xff]  ;;  %v51_v19 = vld [vmem:[#allocation2 + $0x28] sm:$0xff]  ;;  %v141_v20 = vld [vmem:[#allocation2 + $0xb8] sm:$0xff] }
  0x23   :  { %1123 = vmatpush3.msra.mxu0 %v59_v3  ;;  %1158 = vmatpush3.msra.mxu1 %v147_v8  ;;  %v50_v21 = vld [vmem:[#allocation2 + $0x20] sm:$0xff]  ;;  %v140_v22 = vld [vmem:[#allocation2 + $0xb0] sm:$0xff]  ;;  %v49_v23 = vld [vmem:[#allocation2 + $0x18] sm:$0xff] }
  0x24   :  { %1124 = vmatprep.subr.mxu0 %v1545_v0  ;;  %1159 = vmatprep.subr.mxu1 %v1545_v0  ;;  %v139_v24 = vld [vmem:[#allocation2 + $0xa8] sm:$0xff]  ;;  %v48_v25 = vld [vmem:[#allocation2 + $0x10] sm:$0xff]  ;;  %v138_v26 = vld [vmem:[#allocation2 + $0xa0] sm:$0xff] }
  0x25   :  { %1125 = vmatpush3.msra.mxu0 %v58_v4  ;;  %1160 = vmatpush3.msra.mxu1 %v146_v10  ;;  %v47_v27 = vld [vmem:[#allocation2 + $0x8] sm:$0xff]  ;;  %v137_v28 = vld [vmem:[#allocation2 + $0x98] sm:$0xff]  ;;  %v46_v29 = vld [vmem:[#allocation2] sm:$0xff] }
  0x26   :  { %1126 = vmatprep.subr.mxu0 %v1545_v0  ;;  %1161 = vmatprep.subr.mxu1 %v1545_v0  ;;  %v45_v30 = vld [vmem:[%s1768_s0] sm:$0xff]  ;;  %v136_v31 = vld [vmem:[#allocation2 + $0x90] sm:$0xff]  ;;  %v135_v32 = vld [vmem:[#allocation2 + $0x88] sm:$0xff] }
  0x27   :  { %1127 = vmatpush3.msra.mxu0 %v57_v6  ;;  %1162 = vmatpush3.msra.mxu1 %v145_v12  ;;  %v134_v33 = vld [vmem:[#allocation2 + $0x80] sm:$0xff]  ;;  %v237_v34 = vld [vmem:[#allocation2 + $0x178] sm:$0xff]  ;;  %v236_v35 = vld [vmem:[#allocation2 + $0x170] sm:$0xff] }
  0x28   :  { %1128 = vmatprep.subr.mxu0 %v1545_v0  ;;  %1163 = vmatprep.subr.mxu1 %v1545_v0  ;;  %v235_v36 = vld [vmem:[#allocation2 + $0x168] sm:$0xff]  ;;  %v234_v37 = vld [vmem:[#allocation2 + $0x160] sm:$0xff]  ;;  %v233_v38 = vld [vmem:[#allocation2 + $0x158] sm:$0xff] }
  0x29   :  { %1129 = vmatpush3.msra.mxu0 %v56_v9  ;;  %1164 = vmatpush3.msra.mxu1 %v144_v14  ;;  %v232_v39 = vld [vmem:[#allocation2 + $0x150] sm:$0xff]  ;;  %v231_v40 = vld [vmem:[#allocation2 + $0x148] sm:$0xff]  ;;  %v230_v41 = vld [vmem:[#allocation2 + $0x140] sm:$0xff] }
  0x2a   :  { %1130 = vmatprep.subr.mxu0 %v1545_v0  ;;  %1165 = vmatprep.subr.mxu1 %v1545_v0  ;;  %v229_v42 = vld [vmem:[#allocation2 + $0x138] sm:$0xff]  ;;  %v228_v43 = vld [vmem:[#allocation2 + $0x130] sm:$0xff]  ;;  %v227_v44 = vld [vmem:[#allocation2 + $0x128] sm:$0xff] }
  0x2b   :  { %1131 = vmatpush3.msra.mxu0 %v55_v11  ;;  %1166 = vmatpush3.msra.mxu1 %v143_v16  ;;  %v226_v45 = vld [vmem:[#allocation2 + $0x120] sm:$0xff]  ;;  %v225_v46 = vld [vmem:[#allocation2 + $0x118] sm:$0xff]  ;;  %v224_v52 = vld [vmem:[#allocation2 + $0x110] sm:$0xff] }
  0x2c   :  { %1132 = vmatprep.subr.mxu0 %v1545_v0  ;;  %1167 = vmatprep.subr.mxu1 %v1545_v0  ;;  %v62_v47 = vld [vmem:[#allocation5] sm:$0xff]  ;;  %v223_v53 = vld [vmem:[#allocation2 + $0x108] sm:$0xff]  ;;  %v325_v55 = vld [vmem:[#allocation2 + $0x1f8] sm:$0xff] }
  0x2d   :  { %1133 = vmatpush3.msra.mxu0 %v54_v13  ;;  %1168 = vmatpush3.msra.mxu1 %v142_v18  ;;  %v222_v54 = vld [vmem:[#allocation2 + $0x100] sm:$0xff]  ;;  %v324_v56 = vld [vmem:[#allocation2 + $0x1f0] sm:$0xff]  ;;  %v323_v57 = vld [vmem:[#allocation2 + $0x1e8] sm:$0xff] }
  0x2e   :  { %1134 = vmatprep.subr.mxu0 %v1545_v0  ;;  %1169 = vmatprep.subr.mxu1 %v1545_v0  ;;  %v322_v58 = vld [vmem:[#allocation2 + $0x1e0] sm:$0xff]  ;;  %v321_v59 = vld [vmem:[#allocation2 + $0x1d8] sm:$0xff]  ;;  %v320_v60 = vld [vmem:[#allocation2 + $0x1d0] sm:$0xff] }
  0x2f   :  { %1135 = vmatpush3.msra.mxu0 %v53_v15  ;;  %1170 = vmatpush3.msra.mxu1 %v141_v20  ;;  %v319_v61 = vld [vmem:[#allocation2 + $0x1c8] sm:$0xff]  ;;  %v318_v62 = vld [vmem:[#allocation2 + $0x1c0] sm:$0xff]  ;;  %v317_v63 = vld [vmem:[#allocation2 + $0x1b8] sm:$0xff] }
  0x30   :  { %1136 = vmatprep.subr.mxu0 %v1545_v0  ;;  %1171 = vmatprep.subr.mxu1 %v1545_v0  ;;  %v316_v1 = vld [vmem:[#allocation2 + $0x1b0] sm:$0xff]  ;;  %v315_v2 = vld [vmem:[#allocation2 + $0x1a8] sm:$0xff]  ;;  %v314_v3 = vld [vmem:[#allocation2 + $0x1a0] sm:$0xff] }
  0x31   :  { %1137 = vmatpush3.msra.mxu0 %v52_v17  ;;  %1172 = vmatpush3.msra.mxu1 %v140_v22  ;;  %v313_v4 = vld [vmem:[#allocation2 + $0x198] sm:$0xff]  ;;  %v150_v5 = vld [vmem:[#allocation5 + $0x8] sm:$0xff]  ;;  %v312_v10 = vld [vmem:[#allocation2 + $0x190] sm:$0xff] }
  0x32   :  { %1138 = vmatprep.subr.mxu0 %v1545_v0  ;;  %1173 = vmatprep.subr.mxu1 %v1545_v0  ;;  %v311_v11 = vld [vmem:[#allocation2 + $0x188] sm:$0xff]  ;;  %v310_v12 = vld [vmem:[#allocation2 + $0x180] sm:$0xff]  ;;  %v413_v13 = vld [vmem:[#allocation2 + $0x278] sm:$0xff] }
  0x33   :  { %1139 = vmatpush3.msra.mxu0 %v51_v19  ;;  %1174 = vmatpush3.msra.mxu1 %v139_v24  ;;  %v412_v14 = vld [vmem:[#allocation2 + $0x270] sm:$0xff]  ;;  %v411_v15 = vld [vmem:[#allocation2 + $0x268] sm:$0xff]  ;;  %v410_v16 = vld [vmem:[#allocation2 + $0x260] sm:$0xff] }
  0x34   :  { %1140 = vmatprep.subr.mxu0 %v1545_v0  ;;  %1175 = vmatprep.subr.mxu1 %v1545_v0  ;;  %v409_v17 = vld [vmem:[#allocation2 + $0x258] sm:$0xff]  ;;  %v408_v18 = vld [vmem:[#allocation2 + $0x250] sm:$0xff]  ;;  %v407_v19 = vld [vmem:[#allocation2 + $0x248] sm:$0xff] }
  0x35   :  { %1141 = vmatpush3.msra.mxu0 %v50_v21  ;;  %1176 = vmatpush3.msra.mxu1 %v138_v26  ;;  %v406_v20 = vld [vmem:[#allocation2 + $0x240] sm:$0xff]  ;;  %v405_v21 = vld [vmem:[#allocation2 + $0x238] sm:$0xff]  ;;  %v404_v22 = vld [vmem:[#allocation2 + $0x230] sm:$0xff] }
  0x36   :  { %1142 = vmatprep.subr.mxu0 %v1545_v0  ;;  %1177 = vmatprep.subr.mxu1 %v1545_v0  ;;  %v402_v24 = vld [vmem:[#allocation2 + $0x220] sm:$0xff]  ;;  %v238_v26 = vld [vmem:[#allocation5 + $0x10] sm:$0xff] }
  0x37   :  { %1143 = vmatpush3.msra.mxu0 %v49_v23  ;;  %1178 = vmatpush3.msra.mxu1 %v137_v28  ;;  %v403_v23 = vld [vmem:[#allocation2 + $0x228] sm:$0xff] }
  0x38   :  { %1144 = vmatprep.subr.mxu0 %v1545_v0  ;;  %1179 = vmatprep.subr.mxu1 %v1545_v0 }
  0x39   :  { %1145 = vmatpush3.msra.mxu0 %v48_v25  ;;  %1180 = vmatpush3.msra.mxu1 %v136_v31  ;;  %v401_v25 = vld [vmem:[#allocation2 + $0x218] sm:$0xff]  ;;  %v400_v31 = vld [vmem:[#allocation2 + $0x210] sm:$0xff] }
  0x3a   :  { %1146 = vmatprep.subr.mxu0 %v1545_v0  ;;  %1181 = vmatprep.subr.mxu1 %v1545_v0 }
  0x3b   :  { %1147 = vmatpush3.msra.mxu0 %v47_v27  ;;  %1182 = vmatpush3.msra.mxu1 %v135_v32  ;;  %v399_v32 = vld [vmem:[#allocation2 + $0x208] sm:$0xff] }
  0x3c   :  { %1148 = vmatprep.subr.mxu0 %v1545_v0  ;;  %1183 = vmatprep.subr.mxu1 %v1545_v0 }
  0x3d   :  { %1149 = vmatpush3.msra.mxu0 %v46_v29  ;;  %1184 = vmatpush3.msra.mxu1 %v134_v33  ;;  %v398_v33 = vld [vmem:[#allocation2 + $0x200] sm:$0xff] }
  0x3e   :  { %1151 = vmatmul.mubr.f32.vlgmr.msra.gmra.mxu0 %v45_v30  ;;  %1188 = vmatprep.subr.mxu0 %v1545_v0 }
  0x3f   :  { %1220 = vmatprep.mubr.msk.f32.mxu0 %vm1546_vm0, %v1545_v0  ;;  %1223 = vmatprep.subr.mxu1 %v1545_v0 }
  0x40   :  { %1189 = vmatpush3.msra.mxu0 %v237_v34  ;;  %v502_v34 = vld [vmem:[#allocation2 + $0x2f8] sm:$0xff] }
  0x41   :  { %1190 = vmatprep.subr.mxu0 %v1545_v0 }
  0x42   :  { %1191 = vmatpush3.msra.mxu0 %v236_v35  ;;  %v501_v35 = vld [vmem:[#allocation2 + $0x2f0] sm:$0xff] }
  0x43   :  { %1192 = vmatprep.subr.mxu0 %v1545_v0 }
  0x44   :  { %1193 = vmatpush3.msra.mxu0 %v235_v36  ;;  %v500_v36 = vld [vmem:[#allocation2 + $0x2e8] sm:$0xff] }
  0x45   :  { %1194 = vmatprep.subr.mxu0 %v1545_v0 }
  0x46   :  { %1195 = vmatpush3.msra.mxu0 %v234_v37  ;;  %v499_v37 = vld [vmem:[#allocation2 + $0x2e0] sm:$0xff] }
  0x47   :  { %1196 = vmatprep.subr.mxu0 %v1545_v0 }
  0x48   :  { %1197 = vmatpush3.msra.mxu0 %v233_v38  ;;  %v498_v38 = vld [vmem:[#allocation2 + $0x2d8] sm:$0xff] }
  0x49   :  { %1198 = vmatprep.subr.mxu0 %v1545_v0 }
  0x4a   :  { %1199 = vmatpush3.msra.mxu0 %v232_v39  ;;  %v497_v39 = vld [vmem:[#allocation2 + $0x2d0] sm:$0xff] }
  0x4b   :  { %1200 = vmatprep.subr.mxu0 %v1545_v0 }
  0x4c   :  { %1201 = vmatpush3.msra.mxu0 %v231_v40  ;;  %v496_v40 = vld [vmem:[#allocation2 + $0x2c8] sm:$0xff] }
  0x4d   :  { %1202 = vmatprep.subr.mxu0 %v1545_v0 }
  0x4e   :  { %1203 = vmatpush3.msra.mxu0 %v230_v41  ;;  %v495_v41 = vld [vmem:[#allocation2 + $0x2c0] sm:$0xff] }
  0x4f   :  { %1204 = vmatprep.subr.mxu0 %v1545_v0 }
  0x50   :  { %1205 = vmatpush3.msra.mxu0 %v229_v42  ;;  %v494_v42 = vld [vmem:[#allocation2 + $0x2b8] sm:$0xff] }
  0x51   :  { %1206 = vmatprep.subr.mxu0 %v1545_v0 }
  0x52   :  { %1207 = vmatpush3.msra.mxu0 %v228_v43  ;;  %v493_v43 = vld [vmem:[#allocation2 + $0x2b0] sm:$0xff] }
  0x53   :  { %1208 = vmatprep.subr.mxu0 %v1545_v0 }
  0x54   :  { %1209 = vmatpush3.msra.mxu0 %v227_v44  ;;  %v492_v44 = vld [vmem:[#allocation2 + $0x2a8] sm:$0xff] }
  0x55   :  { %1210 = vmatprep.subr.mxu0 %v1545_v0 }
  0x56   :  { %1211 = vmatpush3.msra.mxu0 %v226_v45  ;;  %v491_v45 = vld [vmem:[#allocation2 + $0x2a0] sm:$0xff] }
  0x57   :  { %1212 = vmatprep.subr.mxu0 %v1545_v0 }
  0x58   :  { %1213 = vmatpush3.msra.mxu0 %v225_v46  ;;  %v490_v46 = vld [vmem:[#allocation2 + $0x298] sm:$0xff] }
  0x59   :  { %1214 = vmatprep.subr.mxu0 %v1545_v0 }
  0x5a   :  { %1215 = vmatpush3.msra.mxu0 %v224_v52  ;;  %v489_v52 = vld [vmem:[#allocation2 + $0x290] sm:$0xff] }
  0x5b   :  { %1216 = vmatprep.subr.mxu0 %v1545_v0 }
  0x5c   :  { %1217 = vmatpush3.msra.mxu0 %v223_v53  ;;  %v488_v53 = vld [vmem:[#allocation2 + $0x288] sm:$0xff] }
  0x5d   :  { %1218 = vmatprep.subr.mxu0 %v1545_v0 }
  0x5e   :  { %1219 = vmatpush3.msra.mxu0 %v222_v54  ;;  %v487_v54 = vld [vmem:[#allocation2 + $0x280] sm:$0xff] }
  0x5f   :  { %1258 = vmatprep.subr.mxu0 %v1545_v0 }
  0xfe   :  { %v129_v48 = vpop.f32.mrf.mxu0 }
  0xff   :  { %v130_v49 = vadd.f32 %v129_v48, %v62_v47  ;;  %v326_v47 = vld [vmem:[#allocation5 + $0x18] sm:$0xff] }
 0x100   :  { %v1152_v50 = vpop.f32.mrf.mxu0 }
 0x101   :  { %v133_v51 = vmax.f32 %v130_v49, 0.0 }
 0x103   :  { %1186 = vmatmul.mubr.f32.vlgmr.msra.gmra.mxu1 %v133_v51 }
 0x104   :  { %1255 = vmatprep.mubr.msk.f32.mxu1 %vm1546_vm0, %v1545_v0  ;;  %1224 = vmatpush3.msra.mxu1 %v325_v55  ;;  %v590_v55 = vld [vmem:[#allocation2 + $0x378] sm:$0xff] }
 0x105   :  { %1225 = vmatprep.subr.mxu1 %v1545_v0 }
 0x106   :  { %1226 = vmatpush3.msra.mxu1 %v324_v56  ;;  %v589_v56 = vld [vmem:[#allocation2 + $0x370] sm:$0xff] }
 0x107   :  { %1227 = vmatprep.subr.mxu1 %v1545_v0 }
 0x108   :  { %1228 = vmatpush3.msra.mxu1 %v323_v57  ;;  %v588_v57 = vld [vmem:[#allocation2 + $0x368] sm:$0xff] }
 0x109   :  { %1229 = vmatprep.subr.mxu1 %v1545_v0 }
 0x10a   :  { %1230 = vmatpush3.msra.mxu1 %v322_v58  ;;  %v587_v58 = vld [vmem:[#allocation2 + $0x360] sm:$0xff] }
 0x10b   :  { %1231 = vmatprep.subr.mxu1 %v1545_v0 }
 0x10c   :  { %1232 = vmatpush3.msra.mxu1 %v321_v59  ;;  %v586_v59 = vld [vmem:[#allocation2 + $0x358] sm:$0xff] }
 0x10d   :  { %1233 = vmatprep.subr.mxu1 %v1545_v0 }
 0x10e   :  { %1234 = vmatpush3.msra.mxu1 %v320_v60  ;;  %v585_v60 = vld [vmem:[#allocation2 + $0x350] sm:$0xff] }
 0x10f   :  { %1235 = vmatprep.subr.mxu1 %v1545_v0 }
 0x110   :  { %1236 = vmatpush3.msra.mxu1 %v319_v61  ;;  %v584_v61 = vld [vmem:[#allocation2 + $0x348] sm:$0xff] }
 0x111   :  { %1237 = vmatprep.subr.mxu1 %v1545_v0 }
 0x112   :  { %1238 = vmatpush3.msra.mxu1 %v318_v62  ;;  %v583_v62 = vld [vmem:[#allocation2 + $0x340] sm:$0xff] }
 0x113   :  { %1239 = vmatprep.subr.mxu1 %v1545_v0 }
 0x114   :  { %1240 = vmatpush3.msra.mxu1 %v317_v63  ;;  %v582_v63 = vld [vmem:[#allocation2 + $0x338] sm:$0xff] }
 0x115   :  { %1241 = vmatprep.subr.mxu1 %v1545_v0 }
 0x116   :  { %1242 = vmatpush3.msra.mxu1 %v316_v1  ;;  %v581_v1 = vld [vmem:[#allocation2 + $0x330] sm:$0xff] }
 0x117   :  { %1243 = vmatprep.subr.mxu1 %v1545_v0 }
 0x118   :  { %1244 = vmatpush3.msra.mxu1 %v315_v2  ;;  %v580_v2 = vld [vmem:[#allocation2 + $0x328] sm:$0xff] }
 0x119   :  { %1245 = vmatprep.subr.mxu1 %v1545_v0 }
 0x11a   :  { %1246 = vmatpush3.msra.mxu1 %v314_v3  ;;  %v579_v3 = vld [vmem:[#allocation2 + $0x320] sm:$0xff] }
 0x11b   :  { %1247 = vmatprep.subr.mxu1 %v1545_v0 }
 0x11c   :  { %1248 = vmatpush3.msra.mxu1 %v313_v4  ;;  %v578_v4 = vld [vmem:[#allocation2 + $0x318] sm:$0xff] }
 0x11d   :  { %1249 = vmatprep.subr.mxu1 %v1545_v0 }
 0x11e   :  { %1250 = vmatpush3.msra.mxu1 %v312_v10  ;;  %v577_v10 = vld [vmem:[#allocation2 + $0x310] sm:$0xff] }
 0x11f   :  { %1251 = vmatprep.subr.mxu1 %v1545_v0 }
 0x120   :  { %1252 = vmatpush3.msra.mxu1 %v311_v11  ;;  %v576_v11 = vld [vmem:[#allocation2 + $0x308] sm:$0xff] }
 0x121   :  { %1253 = vmatprep.subr.mxu1 %v1545_v0 }
 0x122   :  { %1254 = vmatpush3.msra.mxu1 %v310_v12  ;;  %v575_v12 = vld [vmem:[#allocation2 + $0x300] sm:$0xff] }
 0x123   :  { %1293 = vmatprep.subr.mxu1 %v1545_v0 }
 0x1c3   :  { %v217_v6 = vpop.f32.mrf.mxu1 }
 0x1c4   :  { %v218_v7 = vadd.f32 %v217_v6, %v150_v5  ;;  %v414_v5 = vld [vmem:[#allocation5 + $0x20] sm:$0xff] }
 0x1c5   :  { %v1187_v8 = vpop.f32.mrf.mxu1 }
 0x1c6   :  { %v221_v9 = vmax.f32 %v218_v7, 0.0 }
 0x1c8   :  { %1221 = vmatmul.mubr.f32.vlgmr.msra.gmra.mxu0 %v221_v9 }
 0x1c9   :  { %1290 = vmatprep.mubr.msk.f32.mxu0 %vm1546_vm0, %v1545_v0  ;;  %1259 = vmatpush3.msra.mxu0 %v413_v13  ;;  %v678_v13 = vld [vmem:[#allocation2 + $0x3f8] sm:$0xff] }
 0x1ca   :  { %1260 = vmatprep.subr.mxu0 %v1545_v0 }
 0x1cb   :  { %1261 = vmatpush3.msra.mxu0 %v412_v14  ;;  %v677_v14 = vld [vmem:[#allocation2 + $0x3f0] sm:$0xff] }
 0x1cc   :  { %1262 = vmatprep.subr.mxu0 %v1545_v0 }
 0x1cd   :  { %1263 = vmatpush3.msra.mxu0 %v411_v15  ;;  %v676_v15 = vld [vmem:[#allocation2 + $0x3e8] sm:$0xff] }
 0x1ce   :  { %1264 = vmatprep.subr.mxu0 %v1545_v0 }
 0x1cf   :  { %1265 = vmatpush3.msra.mxu0 %v410_v16  ;;  %v675_v16 = vld [vmem:[#allocation2 + $0x3e0] sm:$0xff] }
 0x1d0   :  { %1266 = vmatprep.subr.mxu0 %v1545_v0 }
 0x1d1   :  { %1267 = vmatpush3.msra.mxu0 %v409_v17  ;;  %v674_v17 = vld [vmem:[#allocation2 + $0x3d8] sm:$0xff] }
 0x1d2   :  { %1268 = vmatprep.subr.mxu0 %v1545_v0 }
 0x1d3   :  { %1269 = vmatpush3.msra.mxu0 %v408_v18  ;;  %v673_v18 = vld [vmem:[#allocation2 + $0x3d0] sm:$0xff] }
 0x1d4   :  { %1270 = vmatprep.subr.mxu0 %v1545_v0 }
 0x1d5   :  { %1271 = vmatpush3.msra.mxu0 %v407_v19  ;;  %v672_v19 = vld [vmem:[#allocation2 + $0x3c8] sm:$0xff] }
 0x1d6   :  { %1272 = vmatprep.subr.mxu0 %v1545_v0 }
 0x1d7   :  { %1273 = vmatpush3.msra.mxu0 %v406_v20  ;;  %v671_v20 = vld [vmem:[#allocation2 + $0x3c0] sm:$0xff] }
 0x1d8   :  { %1274 = vmatprep.subr.mxu0 %v1545_v0 }
 0x1d9   :  { %1275 = vmatpush3.msra.mxu0 %v405_v21  ;;  %v670_v21 = vld [vmem:[#allocation2 + $0x3b8] sm:$0xff] }
 0x1da   :  { %1276 = vmatprep.subr.mxu0 %v1545_v0 }
 0x1db   :  { %1277 = vmatpush3.msra.mxu0 %v404_v22  ;;  %v669_v22 = vld [vmem:[#allocation2 + $0x3b0] sm:$0xff] }
 0x1dc   :  { %1278 = vmatprep.subr.mxu0 %v1545_v0 }
 0x1dd   :  { %1279 = vmatpush3.msra.mxu0 %v403_v23  ;;  %v668_v23 = vld [vmem:[#allocation2 + $0x3a8] sm:$0xff] }
 0x1de   :  { %1280 = vmatprep.subr.mxu0 %v1545_v0 }
 0x1df   :  { %1281 = vmatpush3.msra.mxu0 %v402_v24  ;;  %v667_v24 = vld [vmem:[#allocation2 + $0x3a0] sm:$0xff] }
 0x1e0   :  { %1282 = vmatprep.subr.mxu0 %v1545_v0 }
 0x1e1   :  { %1283 = vmatpush3.msra.mxu0 %v401_v25  ;;  %v666_v25 = vld [vmem:[#allocation2 + $0x398] sm:$0xff] }
 0x1e2   :  { %1284 = vmatprep.subr.mxu0 %v1545_v0 }
 0x1e3   :  { %1285 = vmatpush3.msra.mxu0 %v400_v31  ;;  %v665_v31 = vld [vmem:[#allocation2 + $0x390] sm:$0xff] }
 0x1e4   :  { %1286 = vmatprep.subr.mxu0 %v1545_v0 }
 0x1e5   :  { %1287 = vmatpush3.msra.mxu0 %v399_v32  ;;  %v664_v32 = vld [vmem:[#allocation2 + $0x388] sm:$0xff] }
 0x1e6   :  { %1288 = vmatprep.subr.mxu0 %v1545_v0 }
 0x1e7   :  { %1289 = vmatpush3.msra.mxu0 %v398_v33  ;;  %v663_v33 = vld [vmem:[#allocation2 + $0x380] sm:$0xff] }
 0x1e8   :  { %1328 = vmatprep.subr.mxu0 %v1545_v0 }
 0x288   :  { %v305_v27 = vpop.f32.mrf.mxu0 }
 0x289   :  { %v306_v28 = vadd.f32 %v305_v27, %v238_v26  ;;  %v503_v26 = vld [vmem:[#allocation5 + $0x28] sm:$0xff] }
 0x28a   :  { %v1222_v29 = vpop.f32.mrf.mxu0 }
 0x28b   :  { %v309_v30 = vmax.f32 %v306_v28, 0.0 }
 0x28d   :  { %1256 = vmatmul.mubr.f32.vlgmr.msra.gmra.mxu1 %v309_v30 }
 0x28e   :  { %1325 = vmatprep.mubr.msk.f32.mxu1 %vm1546_vm0, %v1545_v0  ;;  %1294 = vmatpush3.msra.mxu1 %v502_v34  ;;  %v766_v34 = vld [vmem:[#allocation2 + $0x478] sm:$0xff] }
 0x28f   :  { %1295 = vmatprep.subr.mxu1 %v1545_v0 }
 0x290   :  { %1296 = vmatpush3.msra.mxu1 %v501_v35  ;;  %v765_v35 = vld [vmem:[#allocation2 + $0x470] sm:$0xff] }
 0x291   :  { %1297 = vmatprep.subr.mxu1 %v1545_v0 }
 0x292   :  { %1298 = vmatpush3.msra.mxu1 %v500_v36  ;;  %v764_v36 = vld [vmem:[#allocation2 + $0x468] sm:$0xff] }
 0x293   :  { %1299 = vmatprep.subr.mxu1 %v1545_v0 }
 0x294   :  { %1300 = vmatpush3.msra.mxu1 %v499_v37  ;;  %v763_v37 = vld [vmem:[#allocation2 + $0x460] sm:$0xff] }
 0x295   :  { %1301 = vmatprep.subr.mxu1 %v1545_v0 }
 0x296   :  { %1302 = vmatpush3.msra.mxu1 %v498_v38  ;;  %v762_v38 = vld [vmem:[#allocation2 + $0x458] sm:$0xff] }
 0x297   :  { %1303 = vmatprep.subr.mxu1 %v1545_v0 }
 0x298   :  { %1304 = vmatpush3.msra.mxu1 %v497_v39  ;;  %v761_v39 = vld [vmem:[#allocation2 + $0x450] sm:$0xff] }
 0x299   :  { %1305 = vmatprep.subr.mxu1 %v1545_v0 }
 0x29a   :  { %1306 = vmatpush3.msra.mxu1 %v496_v40  ;;  %v760_v40 = vld [vmem:[#allocation2 + $0x448] sm:$0xff] }
 0x29b   :  { %1307 = vmatprep.subr.mxu1 %v1545_v0 }
 0x29c   :  { %1308 = vmatpush3.msra.mxu1 %v495_v41  ;;  %v759_v41 = vld [vmem:[#allocation2 + $0x440] sm:$0xff] }
 0x29d   :  { %1309 = vmatprep.subr.mxu1 %v1545_v0 }
 0x29e   :  { %1310 = vmatpush3.msra.mxu1 %v494_v42  ;;  %v758_v42 = vld [vmem:[#allocation2 + $0x438] sm:$0xff] }
 0x29f   :  { %1311 = vmatprep.subr.mxu1 %v1545_v0 }
 0x2a0   :  { %1312 = vmatpush3.msra.mxu1 %v493_v43  ;;  %v757_v43 = vld [vmem:[#allocation2 + $0x430] sm:$0xff] }
 0x2a1   :  { %1313 = vmatprep.subr.mxu1 %v1545_v0 }
 0x2a2   :  { %1314 = vmatpush3.msra.mxu1 %v492_v44  ;;  %v756_v44 = vld [vmem:[#allocation2 + $0x428] sm:$0xff] }
 0x2a3   :  { %1315 = vmatprep.subr.mxu1 %v1545_v0 }
 0x2a4   :  { %1316 = vmatpush3.msra.mxu1 %v491_v45  ;;  %v755_v45 = vld [vmem:[#allocation2 + $0x420] sm:$0xff] }
 0x2a5   :  { %1317 = vmatprep.subr.mxu1 %v1545_v0 }
 0x2a6   :  { %1318 = vmatpush3.msra.mxu1 %v490_v46  ;;  %v754_v46 = vld [vmem:[#allocation2 + $0x418] sm:$0xff] }
 0x2a7   :  { %1319 = vmatprep.subr.mxu1 %v1545_v0 }
 0x2a8   :  { %1320 = vmatpush3.msra.mxu1 %v489_v52  ;;  %v753_v52 = vld [vmem:[#allocation2 + $0x410] sm:$0xff] }
 0x2a9   :  { %1321 = vmatprep.subr.mxu1 %v1545_v0 }
 0x2aa   :  { %1322 = vmatpush3.msra.mxu1 %v488_v53  ;;  %v752_v53 = vld [vmem:[#allocation2 + $0x408] sm:$0xff] }
 0x2ab   :  { %1323 = vmatprep.subr.mxu1 %v1545_v0 }
 0x2ac   :  { %1324 = vmatpush3.msra.mxu1 %v487_v54  ;;  %v751_v54 = vld [vmem:[#allocation2 + $0x400] sm:$0xff] }
 0x2ad   :  { %1363 = vmatprep.subr.mxu1 %v1545_v0 }
 0x34d   :  { %v393_v48 = vpop.f32.mrf.mxu1 }
 0x34e   :  { %v394_v49 = vadd.f32 %v393_v48, %v326_v47  ;;  %v591_v47 = vld [vmem:[#allocation5 + $0x30] sm:$0xff] }
 0x34f   :  { %v1257_v50 = vpop.f32.mrf.mxu1 }
 0x350   :  { %v397_v51 = vmax.f32 %v394_v49, 0.0 }
 0x352   :  { %1291 = vmatmul.mubr.f32.vlgmr.msra.gmra.mxu0 %v397_v51 }
 0x353   :  { %1360 = vmatprep.mubr.msk.f32.mxu0 %vm1546_vm0, %v1545_v0  ;;  %1329 = vmatpush3.msra.mxu0 %v590_v55  ;;  %v854_v55 = vld [vmem:[#allocation2 + $0x4f8] sm:$0xff] }
 0x354   :  { %1330 = vmatprep.subr.mxu0 %v1545_v0 }
 0x355   :  { %1331 = vmatpush3.msra.mxu0 %v589_v56  ;;  %v853_v56 = vld [vmem:[#allocation2 + $0x4f0] sm:$0xff] }
 0x356   :  { %1332 = vmatprep.subr.mxu0 %v1545_v0 }
 0x357   :  { %1333 = vmatpush3.msra.mxu0 %v588_v57  ;;  %v852_v57 = vld [vmem:[#allocation2 + $0x4e8] sm:$0xff] }
 0x358   :  { %1334 = vmatprep.subr.mxu0 %v1545_v0 }
 0x359   :  { %1335 = vmatpush3.msra.mxu0 %v587_v58  ;;  %v851_v58 = vld [vmem:[#allocation2 + $0x4e0] sm:$0xff] }
 0x35a   :  { %1336 = vmatprep.subr.mxu0 %v1545_v0 }
 0x35b   :  { %1337 = vmatpush3.msra.mxu0 %v586_v59  ;;  %v850_v59 = vld [vmem:[#allocation2 + $0x4d8] sm:$0xff] }
 0x35c   :  { %1338 = vmatprep.subr.mxu0 %v1545_v0 }
 0x35d   :  { %1339 = vmatpush3.msra.mxu0 %v585_v60  ;;  %v849_v60 = vld [vmem:[#allocation2 + $0x4d0] sm:$0xff] }
 0x35e   :  { %1340 = vmatprep.subr.mxu0 %v1545_v0 }
 0x35f   :  { %1341 = vmatpush3.msra.mxu0 %v584_v61  ;;  %v848_v61 = vld [vmem:[#allocation2 + $0x4c8] sm:$0xff] }
 0x360   :  { %1342 = vmatprep.subr.mxu0 %v1545_v0 }
 0x361   :  { %1343 = vmatpush3.msra.mxu0 %v583_v62  ;;  %v847_v62 = vld [vmem:[#allocation2 + $0x4c0] sm:$0xff] }
 0x362   :  { %1344 = vmatprep.subr.mxu0 %v1545_v0 }
 0x363   :  { %1345 = vmatpush3.msra.mxu0 %v582_v63  ;;  %v846_v63 = vld [vmem:[#allocation2 + $0x4b8] sm:$0xff] }
 0x364   :  { %1346 = vmatprep.subr.mxu0 %v1545_v0 }
 0x365   :  { %1347 = vmatpush3.msra.mxu0 %v581_v1  ;;  %v845_v1 = vld [vmem:[#allocation2 + $0x4b0] sm:$0xff] }
 0x366   :  { %1348 = vmatprep.subr.mxu0 %v1545_v0 }
 0x367   :  { %1349 = vmatpush3.msra.mxu0 %v580_v2  ;;  %v844_v2 = vld [vmem:[#allocation2 + $0x4a8] sm:$0xff] }
 0x368   :  { %1350 = vmatprep.subr.mxu0 %v1545_v0 }
 0x369   :  { %1351 = vmatpush3.msra.mxu0 %v579_v3  ;;  %v843_v3 = vld [vmem:[#allocation2 + $0x4a0] sm:$0xff] }
 0x36a   :  { %1352 = vmatprep.subr.mxu0 %v1545_v0 }
 0x36b   :  { %1353 = vmatpush3.msra.mxu0 %v578_v4  ;;  %v842_v4 = vld [vmem:[#allocation2 + $0x498] sm:$0xff] }
 0x36c   :  { %1354 = vmatprep.subr.mxu0 %v1545_v0 }
 0x36d   :  { %1355 = vmatpush3.msra.mxu0 %v577_v10  ;;  %v841_v10 = vld [vmem:[#allocation2 + $0x490] sm:$0xff] }
 0x36e   :  { %1356 = vmatprep.subr.mxu0 %v1545_v0 }
 0x36f   :  { %1357 = vmatpush3.msra.mxu0 %v576_v11  ;;  %v840_v11 = vld [vmem:[#allocation2 + $0x488] sm:$0xff] }
 0x370   :  { %1358 = vmatprep.subr.mxu0 %v1545_v0 }
 0x371   :  { %1359 = vmatpush3.msra.mxu0 %v575_v12  ;;  %v839_v12 = vld [vmem:[#allocation2 + $0x480] sm:$0xff] }
 0x372   :  { %1398 = vmatprep.subr.mxu0 %v1545_v0 }
 0x412   :  { %v481_v6 = vpop.f32.mrf.mxu0 }
 0x413   :  { %v482_v7 = vadd.f32 %v481_v6, %v414_v5  ;;  %v679_v5 = vld [vmem:[#allocation5 + $0x38] sm:$0xff] }
 0x414   :  { %v1292_v8 = vpop.f32.mrf.mxu0 }
 0x415   :  { %v485_v9 = vmax.f32 %v482_v7, 0.0 }
 0x417   :  { %486 = vst [vmem:[%s1771_s3] sm:$0xff] %v485_v9  ;;  %1326 = vmatmul.mubr.f32.vlgmr.msra.gmra.mxu1 %v485_v9  ;;  %s1547_s3 = smov [#allocation7]  }
 0x418   :  { %1395 = vmatprep.mubr.msk.f32.mxu1 %vm1546_vm0, %v1545_v0  ;;  %1364 = vmatpush3.msra.mxu1 %v678_v13  ;;  %v767_v13 = vld [vmem:[#allocation5 + $0x40] sm:$0xff]  ;;  %s936_s28 = sshll.u32 %s1547_s3, 4  ;;  %s937_s28 = int_to_ptr.vmem [resolvable:$true] %s936_s28 }
 0x419   :  { %1365 = vmatprep.subr.mxu1 %v1545_v0  ;;  %s1515_s29 = scalar_lea.vmem %s937_s28, 128  ;;  %p1520_p11 = scmp.lt.s32.totalorder %s937_s28, %s937_s28 }
 0x41a   :  { %1366 = vmatpush3.msra.mxu1 %v677_v14  ;;  %p1516_p10 = scmp.ne.s32.totalorder %s937_s28, %s1515_s29  ;;  %p1521_p12 = scmp.lt.s32.totalorder %s1515_s29, %s1515_s29 }
 0x41b   :  { %1367 = vmatprep.subr.mxu1 %v1545_v0 }
 0x41c   :  { %1368 = vmatpush3.msra.mxu1 %v676_v15  ;;  %p1522_p13 = por %p1521_p12, %p1520_p11 }
 0x41d   :  { %1369 = vmatprep.subr.mxu1 %v1545_v0 }
 0x41e   :  { %1370 = vmatpush3.msra.mxu1 %v675_v16  ;;  %p1523_p0 = pnand %p1522_p13, %p1516_p10 }
 0x41f   :  { %1371 = vmatprep.subr.mxu1 %v1545_v0 }
 0x420   :  { %1372 = vmatpush3.msra.mxu1 %v674_v17 }
 0x421   :  { %1373 = vmatprep.subr.mxu1 %v1545_v0 }
 0x422   :  { %1374 = vmatpush3.msra.mxu1 %v673_v18  ;;  %v855_v18 = vld [vmem:[#allocation5 + $0x48] sm:$0xff] }
 0x423   :  { %1375 = vmatprep.subr.mxu1 %v1545_v0 }
 0x424   :  { %1376 = vmatpush3.msra.mxu1 %v672_v19 }
 0x425   :  { %1377 = vmatprep.subr.mxu1 %v1545_v0 }
 0x426   :  { %1378 = vmatpush3.msra.mxu1 %v671_v20 }
 0x427   :  { %1379 = vmatprep.subr.mxu1 %v1545_v0 }
 0x428   :  { %1380 = vmatpush3.msra.mxu1 %v670_v21 }
 0x429   :  { %1381 = vmatprep.subr.mxu1 %v1545_v0 }
 0x42a   :  { %1382 = vmatpush3.msra.mxu1 %v669_v22 }
 0x42b   :  { %1383 = vmatprep.subr.mxu1 %v1545_v0 }
 0x42c   :  { %1384 = vmatpush3.msra.mxu1 %v668_v23 }
 0x42d   :  { %1385 = vmatprep.subr.mxu1 %v1545_v0 }
 0x42e   :  { %1386 = vmatpush3.msra.mxu1 %v667_v24 }
 0x42f   :  { %1387 = vmatprep.subr.mxu1 %v1545_v0 }
 0x430   :  { %1388 = vmatpush3.msra.mxu1 %v666_v25 }
 0x431   :  { %1389 = vmatprep.subr.mxu1 %v1545_v0 }
 0x432   :  { %1390 = vmatpush3.msra.mxu1 %v665_v31 }
 0x433   :  { %1391 = vmatprep.subr.mxu1 %v1545_v0 }
 0x434   :  { %1392 = vmatpush3.msra.mxu1 %v664_v32 }
 0x435   :  { %1393 = vmatprep.subr.mxu1 %v1545_v0 }
 0x436   :  { %1394 = vmatpush3.msra.mxu1 %v663_v33 }
 0x437   :  { %1433 = vmatprep.subr.mxu1 %v1545_v0 }
 0x4d7   :  { %v570_v27 = vpop.f32.mrf.mxu1 }
 0x4d8   :  { %v571_v28 = vadd.f32 %v570_v27, %v503_v26 }
 0x4d9   :  { %v1327_v29 = vpop.f32.mrf.mxu1 }
 0x4da   :  { %v574_v30 = vmax.f32 %v571_v28, 0.0 }
 0x4dc   :  { %1361 = vmatmul.mubr.f32.vlgmr.msra.gmra.mxu0 %v574_v30 }
 0x4dd   :  { %1430 = vmatprep.mubr.msk.f32.mxu0 %vm1546_vm0, %v1545_v0  ;;  %1399 = vmatpush3.msra.mxu0 %v766_v34 }
 0x4de   :  { %1400 = vmatprep.subr.mxu0 %v1545_v0 }
 0x4df   :  { %1401 = vmatpush3.msra.mxu0 %v765_v35 }
 0x4e0   :  { %1402 = vmatprep.subr.mxu0 %v1545_v0 }
 0x4e1   :  { %1403 = vmatpush3.msra.mxu0 %v764_v36 }
 0x4e2   :  { %1404 = vmatprep.subr.mxu0 %v1545_v0 }
 0x4e3   :  { %1405 = vmatpush3.msra.mxu0 %v763_v37 }
 0x4e4   :  { %1406 = vmatprep.subr.mxu0 %v1545_v0 }
 0x4e5   :  { %1407 = vmatpush3.msra.mxu0 %v762_v38 }
 0x4e6   :  { %1408 = vmatprep.subr.mxu0 %v1545_v0 }
 0x4e7   :  { %1409 = vmatpush3.msra.mxu0 %v761_v39 }
 0x4e8   :  { %1410 = vmatprep.subr.mxu0 %v1545_v0 }
 0x4e9   :  { %1411 = vmatpush3.msra.mxu0 %v760_v40 }
 0x4ea   :  { %1412 = vmatprep.subr.mxu0 %v1545_v0 }
 0x4eb   :  { %1413 = vmatpush3.msra.mxu0 %v759_v41 }
 0x4ec   :  { %1414 = vmatprep.subr.mxu0 %v1545_v0 }
 0x4ed   :  { %1415 = vmatpush3.msra.mxu0 %v758_v42 }
 0x4ee   :  { %1416 = vmatprep.subr.mxu0 %v1545_v0 }
 0x4ef   :  { %1417 = vmatpush3.msra.mxu0 %v757_v43 }
 0x4f0   :  { %1418 = vmatprep.subr.mxu0 %v1545_v0 }
 0x4f1   :  { %1419 = vmatpush3.msra.mxu0 %v756_v44 }
 0x4f2   :  { %1420 = vmatprep.subr.mxu0 %v1545_v0 }
 0x4f3   :  { %1421 = vmatpush3.msra.mxu0 %v755_v45 }
 0x4f4   :  { %1422 = vmatprep.subr.mxu0 %v1545_v0 }
 0x4f5   :  { %1423 = vmatpush3.msra.mxu0 %v754_v46 }
 0x4f6   :  { %1424 = vmatprep.subr.mxu0 %v1545_v0 }
 0x4f7   :  { %1425 = vmatpush3.msra.mxu0 %v753_v52 }
 0x4f8   :  { %1426 = vmatprep.subr.mxu0 %v1545_v0 }
 0x4f9   :  { %1427 = vmatpush3.msra.mxu0 %v752_v53 }
 0x4fa   :  { %1428 = vmatprep.subr.mxu0 %v1545_v0 }
 0x4fb   :  { %1429 = vmatpush3.msra.mxu0 %v751_v54 }
 0x59c   :  { %v658_v48 = vpop.f32.mrf.mxu0 }
 0x59d   :  { %v659_v49 = vadd.f32 %v658_v48, %v591_v47 }
 0x59e   :  { %v1362_v50 = vpop.f32.mrf.mxu0 }
 0x59f   :  { %v662_v51 = vmax.f32 %v659_v49, 0.0 }
 0x5a1   :  { %1396 = vmatmul.mubr.f32.vlgmr.msra.gmra.mxu1 %v662_v51 }
 0x5a2   :  { %1465 = vmatprep.mubr.msk.f32.mxu1 %vm1546_vm0, %v1545_v0  ;;  %1434 = vmatpush3.msra.mxu1 %v854_v55 }
 0x5a3   :  { %1435 = vmatprep.subr.mxu1 %v1545_v0 }
 0x5a4   :  { %1436 = vmatpush3.msra.mxu1 %v853_v56 }
 0x5a5   :  { %1437 = vmatprep.subr.mxu1 %v1545_v0 }
 0x5a6   :  { %1438 = vmatpush3.msra.mxu1 %v852_v57 }
 0x5a7   :  { %1439 = vmatprep.subr.mxu1 %v1545_v0 }
 0x5a8   :  { %1440 = vmatpush3.msra.mxu1 %v851_v58 }
 0x5a9   :  { %1441 = vmatprep.subr.mxu1 %v1545_v0 }
 0x5aa   :  { %1442 = vmatpush3.msra.mxu1 %v850_v59 }
 0x5ab   :  { %1443 = vmatprep.subr.mxu1 %v1545_v0 }
 0x5ac   :  { %1444 = vmatpush3.msra.mxu1 %v849_v60 }
 0x5ad   :  { %1445 = vmatprep.subr.mxu1 %v1545_v0 }
 0x5ae   :  { %1446 = vmatpush3.msra.mxu1 %v848_v61 }
 0x5af   :  { %1447 = vmatprep.subr.mxu1 %v1545_v0 }
 0x5b0   :  { %1448 = vmatpush3.msra.mxu1 %v847_v62 }
 0x5b1   :  { %1449 = vmatprep.subr.mxu1 %v1545_v0 }
 0x5b2   :  { %1450 = vmatpush3.msra.mxu1 %v846_v63 }
 0x5b3   :  { %1451 = vmatprep.subr.mxu1 %v1545_v0 }
 0x5b4   :  { %1452 = vmatpush3.msra.mxu1 %v845_v1 }
 0x5b5   :  { %1453 = vmatprep.subr.mxu1 %v1545_v0 }
 0x5b6   :  { %1454 = vmatpush3.msra.mxu1 %v844_v2 }
 0x5b7   :  { %1455 = vmatprep.subr.mxu1 %v1545_v0 }
 0x5b8   :  { %1456 = vmatpush3.msra.mxu1 %v843_v3 }
 0x5b9   :  { %1457 = vmatprep.subr.mxu1 %v1545_v0 }
 0x5ba   :  { %1458 = vmatpush3.msra.mxu1 %v842_v4 }
 0x5bb   :  { %1459 = vmatprep.subr.mxu1 %v1545_v0 }
 0x5bc   :  { %1460 = vmatpush3.msra.mxu1 %v841_v10 }
 0x5bd   :  { %1461 = vmatprep.subr.mxu1 %v1545_v0 }
 0x5be   :  { %1462 = vmatpush3.msra.mxu1 %v840_v11 }
 0x5bf   :  { %1463 = vmatprep.subr.mxu1 %v1545_v0 }
 0x5c0   :  { %1464 = vmatpush3.msra.mxu1 %v839_v12 }
 0x661   :  { %v746_v6 = vpop.f32.mrf.mxu1 }
 0x662   :  { %v747_v7 = vadd.f32 %v746_v6, %v679_v5 }
 0x663   :  { %v1397_v8 = vpop.f32.mrf.mxu1 }
 0x664   :  { %v750_v9 = vmax.f32 %v747_v7, 0.0 }
 0x666   :  { %1431 = vmatmul.mubr.f32.vlgmr.msra.gmra.mxu0 %v750_v9 }
 0x726   :  { %v834_v14 = vpop.f32.mrf.mxu0 }
 0x727   :  { %v835_v15 = vadd.f32 %v834_v14, %v767_v13 }
 0x728   :  { %v1432_v16 = vpop.f32.mrf.mxu0 }
 0x729   :  { %v838_v17 = vmax.f32 %v835_v15, 0.0 }
 0x72b   :  { %1466 = vmatmul.mubr.f32.vlgmr.msra.gmra.mxu1 %v838_v17 }
 0x7eb   :  { %v922_v19 = vpop.f32.mrf.mxu1 }
 0x7ec   :  { %v923_v20 = vadd.f32 %v922_v19, %v855_v18 }
 0x7ed   :  { %v1467_v21 = vpop.f32.mrf.mxu1 }
 0x7ee   :  { %v926_v22 = vmax.f32 %v923_v20, 0.0 }
 0x7f0   :  { %927 = vst [vmem:[#allocation7] sm:$0xff] %v926_v22 }
 0x7f1   :  { %1526 = shalt.err (!%p1523_p0)
}
 0x7f2   :  { %939 = dma.vmem_to_hbm [thread:$0]  %s937_s28, 128, %s1772_s4, [#allocation4]  }
 0x7f3   :  { %1539 = dma.done.wait [#allocation4], 128  }
 0x7f4   :  { %1540 = vsyncadd [#allocation4], 4294967168 }
 0x7f5   :  { %945 = vsyncpa [#allocation3], 1 }
 0x7f6   :  { %946 = vsyncpa [#allocation6], 1 }
 0x7f7   :  { %947 = vsyncpa [#allocation4], 1 }

</bundles_post_ra>
